<compile_context>
chip_gen: v7x
topology: tpu7x:2x2x1
jax: 0.10.0
libtpu: 0.0.40
codegen_flags: <defaults>
</compile_context>

<pallas_src>
import functools
import math

import jax
import jax.numpy as jnp
from jax.experimental import pallas as pl
from jax.experimental.pallas import tpu as pltpu

# -------------------- model hyper-parameters (small, deterministic) ----------
B = 2          # batch
L = 8          # sequence length (== max_len)
D_MODEL = 32
N_HEADS = 4
D_K = 8
D_V = 8
D_FF = 64
EPS = 1e-5


# ------------------------------ helpers --------------------------------------
def _layernorm_1pass(x):
    """Single-pass LayerNorm (weight=1, bias=0): E[x] and E[x^2] computed
    independently so the two cross-lane reductions are not serially dependent."""
    mu = jnp.mean(x, axis=-1, keepdims=True)
    mu2 = jnp.mean(x * x, axis=-1, keepdims=True)
    return (x - mu) * jax.lax.rsqrt(mu2 - mu * mu + EPS)


def _layernorm_ref(x):
    mu = jnp.mean(x, axis=-1, keepdims=True)
    var = jnp.mean((x - mu) ** 2, axis=-1, keepdims=True)
    return (x - mu) * jax.lax.rsqrt(var + EPS)


# ------------------------------- Pallas kernel --------------------------------
def encoder_layer_kernel(x_ref, wqkv_ref, wog_ref, w1_ref, w2_ref, dmask_ref,
                         out_ref, ret_ref, *, bt, seq_len, n_heads, d_k, d_v,
                         d_model):
    f32 = jnp.float32
    bf16 = jnp.bfloat16
    lq = seq_len
    g = bt * n_heads

    x = x_ref[...]                                     # [bt*L, D_MODEL] f32

    # ---- LayerNorm 1 (fresh nn.LayerNorm: weight=1, bias=0), f32 math ----
    ln1 = _layernorm_1pass(x)

    # ---- fused Q/K/V projection; 1/sqrt(d_k) already folded into W_Q columns ----
    qkv = jnp.dot(ln1.astype(bf16), wqkv_ref[...], preferred_element_type=f32)
    qkv = qkv.reshape(bt, lq, qkv.shape[-1])           # leading-dim split: free

    def gather_heads(base, d):
        # [bt, L, lanes] -> [bt*H, L, d]: H lane slices stacked on a new major axis,
        # then a leading-dims-only merge (no minor-dim reshapes / transposes).
        parts = [qkv[:, :, base + h * d: base + (h + 1) * d] for h in range(n_heads)]
        return jnp.stack(parts, axis=1).reshape(g, lq, d).astype(bf16)

    qg = gather_heads(0, d_k)                          # [g, L, d_k]
    kg = gather_heads(n_heads * d_k, d_k)              # [g, L, d_k]
    vg = gather_heads(2 * n_heads * d_k, d_v)          # [g, L, d_v]

    # ---- retention, batched over g = batch*heads (leading batch dim on MXU) ----
    s = jnp.einsum('gld,gmd->glm', qg, kg, preferred_element_type=f32)   # [g, L, L]
    s = s * dmask_ref[...]                                               # decay mask
    ret_ref[...] = s.reshape(bt, n_heads, lq, lq)      # natural layout store

    o = jnp.einsum('glm,gmd->gld', s.astype(bf16), vg,
                   preferred_element_type=f32)                           # [g, L, d_v]

    # per-(batch,head) output projection, then reduce over heads (major-axis sum)
    attn_g = jnp.einsum('gld,gde->gle', o.astype(bf16), wog_ref[...],
                        preferred_element_type=f32)                      # [g, L, D]
    attn = attn_g.reshape(bt, n_heads, lq, d_model).sum(axis=1)          # [bt, L, D]
    attn = attn.reshape(bt * lq, d_model)

    # ---- residual 1, LayerNorm 2, FFN, residual 2 (f32 elementwise path) ----
    res1 = attn + x
    ln2 = _layernorm_1pass(res1)
    h1 = jnp.maximum(jnp.dot(ln2.astype(bf16), w1_ref[...],
                             preferred_element_type=f32), 0.0)
    ffn = jnp.dot(h1.astype(bf16), w2_ref[...], preferred_element_type=f32)
    out_ref[...] = ffn + res1                          # natural layout store


# ------------------------------- wrapper ---------------------------------------
def encoder_layer(x, params, d_mask):
    """x: [B, L, D_MODEL] f32. Returns (enc_outputs [B,L,D], retention [B,H,L,L])."""
    b, l, dm = x.shape
    wq, wk, wv, wo, w1, w2 = params
    bt = b

    # fused QKV weight: fold the 1/sqrt(d_k) score scale into W_Q, lane-pad to 128,
    # pre-cast to bf16 (halves weight DMA bytes, removes in-kernel weight casts).
    scale = 1.0 / math.sqrt(D_K)
    wqkv = jnp.concatenate([wq * scale, wk, wv], axis=1)         # [D, 3*H*d_k]
    pad = (-wqkv.shape[1]) % 128
    if pad:
        wqkv = jnp.pad(wqkv, ((0, 0), (0, pad)))                 # [D, 128]
    wqkv = wqkv.astype(jnp.bfloat16)

    # per-head W_O replicated over batch so the output projection is one batched einsum
    wo_g = jnp.tile(wo.reshape(N_HEADS, D_V, dm), (bt, 1, 1)).astype(jnp.bfloat16)
    w1b = w1.astype(jnp.bfloat16)
    w2b = w2.astype(jnp.bfloat16)
    # decay mask replicated over batch: [bt*H, L, L]
    dmask_g = jnp.tile(d_mask, (bt, 1, 1)).astype(jnp.float32)

    x2 = x.reshape(b * l, dm)            # free metadata reshape at HBM level

    kern = functools.partial(
        encoder_layer_kernel, bt=bt, seq_len=l, n_heads=N_HEADS,
        d_k=D_K, d_v=D_V, d_model=dm)

    out_flat, retention = pl.pallas_call(
        kern,
        out_shape=(
            jax.ShapeDtypeStruct((b * l, dm), jnp.float32),           # [16, 32]
            jax.ShapeDtypeStruct((b, N_HEADS, l, l), jnp.float32),    # [2, 4, 8, 8]
        ),
        grid_spec=pltpu.PrefetchScalarGridSpec(
            num_scalar_prefetch=0,
            grid=(1,),                                      # whole layer in one step
            in_specs=[
                pl.BlockSpec((b * l, dm), lambda i: (0, 0)),          # activations
                pl.BlockSpec(wqkv.shape, lambda i: (0, 0)),           # fused W_QKV
                pl.BlockSpec(wo_g.shape, lambda i: (0, 0, 0)),        # per-head W_O
                pl.BlockSpec(w1b.shape, lambda i: (0, 0)),            # FFN W1
                pl.BlockSpec(w2b.shape, lambda i: (0, 0)),            # FFN W2
                pl.BlockSpec(dmask_g.shape, lambda i: (0, 0, 0)),     # decay mask
            ],
            out_specs=[
                pl.BlockSpec((b * l, dm), lambda i: (0, 0)),
                pl.BlockSpec((b, N_HEADS, l, l), lambda i: (0, 0, 0, 0)),
            ],
        ),
        compiler_params=pltpu.CompilerParams(
            dimension_semantics=("arbitrary",)),
    )(x2, wqkv, wo_g, w1b, w2b, dmask_g)

    return out_flat.reshape(b, l, dm), retention


# ------------------------- pure-JAX reference ----------------------------------
def encoder_layer_ref(x, params, d_mask):
    wq, wk, wv, wo, w1, w2 = params
    b, l, _ = x.shape
    ln1 = _layernorm_ref(x)
    q = (ln1 @ wq).reshape(b, l, N_HEADS, D_K).transpose(0, 2, 1, 3)
    k = (ln1 @ wk).reshape(b, l, N_HEADS, D_K).transpose(0, 2, 1, 3)
    v = (ln1 @ wv).reshape(b, l, N_HEADS, D_V).transpose(0, 2, 1, 3)
    s = jnp.einsum('bhqd,bhkd->bhqk', q, k) / math.sqrt(D_K)
    s = s * d_mask[None]
    o = jnp.einsum('bhqk,bhkd->bhqd', s, v)
    o = o.transpose(0, 2, 1, 3).reshape(b, l, N_HEADS * D_V)
    attn = o @ wo
    res1 = attn + x
    ln2 = _layernorm_ref(res1)
    ffn = jnp.maximum(ln2 @ w1, 0.0) @ w2
    return ffn + res1, s


# ------------------------------- main -------------------------------------------
if __name__ == "__main__":
    key = jax.random.PRNGKey(0)
    kx, k1, k2, k3, k4, k5, k6 = jax.random.split(key, 7)

    x = jax.random.normal(kx, (B, L, D_MODEL), dtype=jnp.float32)

    init = lambda k, shape: (0.02 * jax.random.normal(k, shape)).astype(jnp.float32)
    wq = init(k1, (D_MODEL, N_HEADS * D_K))
    wk = init(k2, (D_MODEL, N_HEADS * D_K))
    wv = init(k3, (D_MODEL, N_HEADS * D_V))
    wo = init(k4, (N_HEADS * D_V, D_MODEL))
    w1 = init(k5, (D_MODEL, D_FF))
    w2 = init(k6, (D_FF, D_MODEL))
    params = (wq, wk, wv, wo, w1, w2)

    # per-head RetNet decay matrix: D[h, n, m] = gamma_h^(n-m) for n >= m else 0
    gammas = 1.0 - 2.0 ** (-5.0 - jnp.arange(N_HEADS, dtype=jnp.float32))
    n_idx = jnp.arange(L, dtype=jnp.float32)[:, None]
    m_idx = jnp.arange(L, dtype=jnp.float32)[None, :]
    diff = n_idx - m_idx
    d_mask = jnp.where(diff >= 0,
                       gammas[:, None, None] ** diff[None, :, :],
                       0.0).astype(jnp.float32)                 # [H, L, L]

    out, retention = encoder_layer(x, params, d_mask)
    out = jax.block_until_ready(out)
    retention = jax.block_until_ready(retention)

    # sanity check vs. pure-JAX reference
    out_ref, ret_ref = encoder_layer_ref(x, params, d_mask)
    tol = 1e-2
    assert out.shape == (B, L, D_MODEL) and retention.shape == (B, N_HEADS, L, L)
    assert jnp.allclose(out, out_ref, atol=tol, rtol=tol), "enc_outputs mismatch"
    assert jnp.allclose(retention, ret_ref, atol=tol, rtol=tol), "retention mismatch"

    print("KERNEL_OK")
</pallas_src>

<mosaic_0001>
module attributes {stable_mosaic.version = 11 : i64} {
  func.func @encoder_layer_kernel(%arg0: i32, %arg1: memref<16x32xf32, #tpu.memory_space<vmem>>, %arg2: memref<32x128xbf16, #tpu.memory_space<vmem>>, %arg3: memref<8x8x32xbf16, #tpu.memory_space<vmem>>, %arg4: memref<32x64xbf16, #tpu.memory_space<vmem>>, %arg5: memref<64x32xbf16, #tpu.memory_space<vmem>>, %arg6: memref<8x8x8xf32, #tpu.memory_space<vmem>>, %arg7: memref<16x32xf32, #tpu.memory_space<vmem>>, %arg8: memref<2x4x8x8xf32, #tpu.memory_space<vmem>>) attributes {dimension_semantics = [#tpu.dimension_semantics<arbitrary>], iteration_bounds = array<i64: 1>, scalar_prefetch = 0 : i64, scratch_operands = 0 : i64, tpu.core_type = #tpu.core_type<tc>, window_params = [{pipeline_mode = #tpu.pipeline_mode<synchronous>, transform_indices = @transform_0, window_bounds = array<i64: 16, 32>}, {pipeline_mode = #tpu.pipeline_mode<synchronous>, transform_indices = @transform_1, window_bounds = array<i64: 32, 128>}, {pipeline_mode = #tpu.pipeline_mode<synchronous>, transform_indices = @transform_2, window_bounds = array<i64: 8, 8, 32>}, {pipeline_mode = #tpu.pipeline_mode<synchronous>, transform_indices = @transform_3, window_bounds = array<i64: 32, 64>}, {pipeline_mode = #tpu.pipeline_mode<synchronous>, transform_indices = @transform_4, window_bounds = array<i64: 64, 32>}, {pipeline_mode = #tpu.pipeline_mode<synchronous>, transform_indices = @transform_5, window_bounds = array<i64: 8, 8, 8>}, {pipeline_mode = #tpu.pipeline_mode<synchronous>, transform_indices = @transform_6, window_bounds = array<i64: 16, 32>}, {pipeline_mode = #tpu.pipeline_mode<synchronous>, transform_indices = @transform_7, window_bounds = array<i64: 2, 4, 8, 8>}]} {
    %c0 = arith.constant 0 : index
    %c0_0 = arith.constant 0 : index
    %0 = vector.load %arg1[%c0, %c0_0] : memref<16x32xf32, #tpu.memory_space<vmem>>, vector<16x32xf32>
    %cst = arith.constant dense<0.000000e+00> : vector<16xf32>
    %1 = vector.multi_reduction <add>, %0, %cst [1] : vector<16x32xf32> to vector<16xf32>
    %2 = vector.shape_cast %1 : vector<16xf32> to vector<16x1xf32>
    %cst_1 = arith.constant 3.200000e+01 : f32
    %3 = vector.broadcast %cst_1 : f32 to vector<16x1xf32>
    %4 = arith.divf %2, %3 : vector<16x1xf32>
    %5 = arith.mulf %0, %0 : vector<16x32xf32>
    %cst_2 = arith.constant dense<0.000000e+00> : vector<16xf32>
    %6 = vector.multi_reduction <add>, %5, %cst_2 [1] : vector<16x32xf32> to vector<16xf32>
    %7 = vector.shape_cast %6 : vector<16xf32> to vector<16x1xf32>
    %cst_3 = arith.constant 3.200000e+01 : f32
    %8 = vector.broadcast %cst_3 : f32 to vector<16x1xf32>
    %9 = arith.divf %7, %8 : vector<16x1xf32>
    %10 = vector.broadcast %4 : vector<16x1xf32> to vector<16x32xf32>
    %11 = arith.subf %0, %10 : vector<16x32xf32>
    %12 = arith.mulf %4, %4 : vector<16x1xf32>
    %13 = arith.subf %9, %12 : vector<16x1xf32>
    %cst_4 = arith.constant 9.99999974E-6 : f32
    %14 = vector.broadcast %cst_4 : f32 to vector<16x1xf32>
    %15 = arith.addf %13, %14 : vector<16x1xf32>
    %16 = math.rsqrt %15 : vector<16x1xf32>
    %17 = vector.broadcast %16 : vector<16x1xf32> to vector<16x32xf32>
    %18 = arith.mulf %11, %17 : vector<16x32xf32>
    %19 = arith.truncf %18 : vector<16x32xf32> to vector<16x32xbf16>
    %c0_5 = arith.constant 0 : index
    %c0_6 = arith.constant 0 : index
    %20 = vector.load %arg2[%c0_5, %c0_6] : memref<32x128xbf16, #tpu.memory_space<vmem>>, vector<32x128xbf16>
    %cst_7 = arith.constant dense<0.000000e+00> : vector<16x128xf32>
    %21 = tpu.matmul %19, %20, %cst_7 {dimension_numbers = #tpu.dot_dimension_numbers<[1], [0], [0], [1], [0, 0, 1, 1], [], []>} : vector<16x32xbf16>, vector<32x128xbf16>, vector<16x128xf32> -> vector<16x128xf32>
    %22 = vector.shape_cast %21 : vector<16x128xf32> to vector<2x8x128xf32>
    %23 = vector.extract_strided_slice %22 {offsets = [0, 0, 0], sizes = [2, 8, 8], strides = [1, 1, 1]} : vector<2x8x128xf32> to vector<2x8x8xf32>
    %24 = vector.extract_strided_slice %22 {offsets = [0, 0, 8], sizes = [2, 8, 8], strides = [1, 1, 1]} : vector<2x8x128xf32> to vector<2x8x8xf32>
    %25 = vector.extract_strided_slice %22 {offsets = [0, 0, 16], sizes = [2, 8, 8], strides = [1, 1, 1]} : vector<2x8x128xf32> to vector<2x8x8xf32>
    %26 = vector.extract_strided_slice %22 {offsets = [0, 0, 24], sizes = [2, 8, 8], strides = [1, 1, 1]} : vector<2x8x128xf32> to vector<2x8x8xf32>
    %27 = vector.shape_cast %23 : vector<2x8x8xf32> to vector<2x1x8x8xf32>
    %28 = vector.shape_cast %24 : vector<2x8x8xf32> to vector<2x1x8x8xf32>
    %29 = vector.shape_cast %25 : vector<2x8x8xf32> to vector<2x1x8x8xf32>
    %30 = vector.shape_cast %26 : vector<2x8x8xf32> to vector<2x1x8x8xf32>
    %31 = tpu.concatenate %27, %28, %29, %30 in 1 : vector<2x1x8x8xf32>, vector<2x1x8x8xf32>, vector<2x1x8x8xf32>, vector<2x1x8x8xf32> -> vector<2x4x8x8xf32>
    %32 = vector.shape_cast %31 : vector<2x4x8x8xf32> to vector<8x8x8xf32>
    %33 = arith.truncf %32 : vector<8x8x8xf32> to vector<8x8x8xbf16>
    %34 = vector.extract_strided_slice %22 {offsets = [0, 0, 32], sizes = [2, 8, 8], strides = [1, 1, 1]} : vector<2x8x128xf32> to vector<2x8x8xf32>
    %35 = vector.extract_strided_slice %22 {offsets = [0, 0, 40], sizes = [2, 8, 8], strides = [1, 1, 1]} : vector<2x8x128xf32> to vector<2x8x8xf32>
    %36 = vector.extract_strided_slice %22 {offsets = [0, 0, 48], sizes = [2, 8, 8], strides = [1, 1, 1]} : vector<2x8x128xf32> to vector<2x8x8xf32>
    %37 = vector.extract_strided_slice %22 {offsets = [0, 0, 56], sizes = [2, 8, 8], strides = [1, 1, 1]} : vector<2x8x128xf32> to vector<2x8x8xf32>
    %38 = vector.shape_cast %34 : vector<2x8x8xf32> to vector<2x1x8x8xf32>
    %39 = vector.shape_cast %35 : vector<2x8x8xf32> to vector<2x1x8x8xf32>
    %40 = vector.shape_cast %36 : vector<2x8x8xf32> to vector<2x1x8x8xf32>
    %41 = vector.shape_cast %37 : vector<2x8x8xf32> to vector<2x1x8x8xf32>
    %42 = tpu.concatenate %38, %39, %40, %41 in 1 : vector<2x1x8x8xf32>, vector<2x1x8x8xf32>, vector<2x1x8x8xf32>, vector<2x1x8x8xf32> -> vector<2x4x8x8xf32>
    %43 = vector.shape_cast %42 : vector<2x4x8x8xf32> to vector<8x8x8xf32>
    %44 = arith.truncf %43 : vector<8x8x8xf32> to vector<8x8x8xbf16>
    %45 = vector.extract_strided_slice %22 {offsets = [0, 0, 64], sizes = [2, 8, 8], strides = [1, 1, 1]} : vector<2x8x128xf32> to vector<2x8x8xf32>
    %46 = vector.extract_strided_slice %22 {offsets = [0, 0, 72], sizes = [2, 8, 8], strides = [1, 1, 1]} : vector<2x8x128xf32> to vector<2x8x8xf32>
    %47 = vector.extract_strided_slice %22 {offsets = [0, 0, 80], sizes = [2, 8, 8], strides = [1, 1, 1]} : vector<2x8x128xf32> to vector<2x8x8xf32>
    %48 = vector.extract_strided_slice %22 {offsets = [0, 0, 88], sizes = [2, 8, 8], strides = [1, 1, 1]} : vector<2x8x128xf32> to vector<2x8x8xf32>
    %49 = vector.shape_cast %45 : vector<2x8x8xf32> to vector<2x1x8x8xf32>
    %50 = vector.shape_cast %46 : vector<2x8x8xf32> to vector<2x1x8x8xf32>
    %51 = vector.shape_cast %47 : vector<2x8x8xf32> to vector<2x1x8x8xf32>
    %52 = vector.shape_cast %48 : vector<2x8x8xf32> to vector<2x1x8x8xf32>
    %53 = tpu.concatenate %49, %50, %51, %52 in 1 : vector<2x1x8x8xf32>, vector<2x1x8x8xf32>, vector<2x1x8x8xf32>, vector<2x1x8x8xf32> -> vector<2x4x8x8xf32>
    %54 = vector.shape_cast %53 : vector<2x4x8x8xf32> to vector<8x8x8xf32>
    %55 = arith.truncf %54 : vector<8x8x8xf32> to vector<8x8x8xbf16>
    "tpu.trace_start"() <{level = 10 : i32, message = "gld,gmd->glm"}> : () -> ()
    %cst_8 = arith.constant dense<0.000000e+00> : vector<8x8x8xf32>
    %56 = tpu.matmul %33, %44, %cst_8 {dimension_numbers = #tpu.dot_dimension_numbers<[2], [2], [1], [1], [0, 0, 0, 1, 1, 1], [0], [0]>} : vector<8x8x8xbf16>, vector<8x8x8xbf16>, vector<8x8x8xf32> -> vector<8x8x8xf32>
    "tpu.trace_stop"() : () -> ()
    %c0_9 = arith.constant 0 : index
    %c0_10 = arith.constant 0 : index
    %c0_11 = arith.constant 0 : index
    %57 = vector.load %arg6[%c0_9, %c0_10, %c0_11] : memref<8x8x8xf32, #tpu.memory_space<vmem>>, vector<8x8x8xf32>
    %58 = arith.mulf %56, %57 : vector<8x8x8xf32>
    %59 = vector.shape_cast %58 : vector<8x8x8xf32> to vector<2x4x8x8xf32>
    %c0_12 = arith.constant 0 : index
    %c0_13 = arith.constant 0 : index
    %c0_14 = arith.constant 0 : index
    %c0_15 = arith.constant 0 : index
    %60 = vector.load %arg8[%c0_12, %c0_13, %c0_14, %c0_15] : memref<2x4x8x8xf32, #tpu.memory_space<vmem>>, vector<2x4x8x8xf32>
    tpu.vector_store %arg8[%c0_12, %c0_13, %c0_14, %c0_15], %59 {strides = array<i32>} : memref<2x4x8x8xf32, #tpu.memory_space<vmem>>, vector<2x4x8x8xf32>,
    %61 = arith.truncf %58 : vector<8x8x8xf32> to vector<8x8x8xbf16>
    "tpu.trace_start"() <{level = 10 : i32, message = "glm,gmd->gld"}> : () -> ()
    %cst_16 = arith.constant dense<0.000000e+00> : vector<8x8x8xf32>
    %62 = tpu.matmul %61, %55, %cst_16 {dimension_numbers = #tpu.dot_dimension_numbers<[2], [1], [1], [2], [0, 0, 0, 1, 1, 2], [0], [0]>} : vector<8x8x8xbf16>, vector<8x8x8xbf16>, vector<8x8x8xf32> -> vector<8x8x8xf32>
    "tpu.trace_stop"() : () -> ()
    %63 = arith.truncf %62 : vector<8x8x8xf32> to vector<8x8x8xbf16>
    %c0_17 = arith.constant 0 : index
    %c0_18 = arith.constant 0 : index
    %c0_19 = arith.constant 0 : index
    %64 = vector.load %arg3[%c0_17, %c0_18, %c0_19] : memref<8x8x32xbf16, #tpu.memory_space<vmem>>, vector<8x8x32xbf16>
    "tpu.trace_start"() <{level = 10 : i32, message = "gld,gde->gle"}> : () -> ()
    %cst_20 = arith.constant dense<0.000000e+00> : vector<8x8x32xf32>
    %65 = tpu.matmul %63, %64, %cst_20 {dimension_numbers = #tpu.dot_dimension_numbers<[2], [1], [1], [2], [0, 0, 0, 1, 1, 2], [0], [0]>} : vector<8x8x8xbf16>, vector<8x8x32xbf16>, vector<8x8x32xf32> -> vector<8x8x32xf32>
    "tpu.trace_stop"() : () -> ()
    %66 = vector.shape_cast %65 : vector<8x8x32xf32> to vector<2x4x8x32xf32>
    %cst_21 = arith.constant dense<0.000000e+00> : vector<2x8x32xf32>
    %67 = vector.multi_reduction <add>, %66, %cst_21 [1] : vector<2x4x8x32xf32> to vector<2x8x32xf32>
    %68 = vector.shape_cast %67 : vector<2x8x32xf32> to vector<16x32xf32>
    %69 = arith.addf %68, %0 : vector<16x32xf32>
    %cst_22 = arith.constant dense<0.000000e+00> : vector<16xf32>
    %70 = vector.multi_reduction <add>, %69, %cst_22 [1] : vector<16x32xf32> to vector<16xf32>
    %71 = vector.shape_cast %70 : vector<16xf32> to vector<16x1xf32>
    %cst_23 = arith.constant 3.200000e+01 : f32
    %72 = vector.broadcast %cst_23 : f32 to vector<16x1xf32>
    %73 = arith.divf %71, %72 : vector<16x1xf32>
    %74 = arith.mulf %69, %69 : vector<16x32xf32>
    %cst_24 = arith.constant dense<0.000000e+00> : vector<16xf32>
    %75 = vector.multi_reduction <add>, %74, %cst_24 [1] : vector<16x32xf32> to vector<16xf32>
    %76 = vector.shape_cast %75 : vector<16xf32> to vector<16x1xf32>
    %cst_25 = arith.constant 3.200000e+01 : f32
    %77 = vector.broadcast %cst_25 : f32 to vector<16x1xf32>
    %78 = arith.divf %76, %77 : vector<16x1xf32>
    %79 = vector.broadcast %73 : vector<16x1xf32> to vector<16x32xf32>
    %80 = arith.subf %69, %79 : vector<16x32xf32>
    %81 = arith.mulf %73, %73 : vector<16x1xf32>
    %82 = arith.subf %78, %81 : vector<16x1xf32>
    %cst_26 = arith.constant 9.99999974E-6 : f32
    %83 = vector.broadcast %cst_26 : f32 to vector<16x1xf32>
    %84 = arith.addf %82, %83 : vector<16x1xf32>
    %85 = math.rsqrt %84 : vector<16x1xf32>
    %86 = vector.broadcast %85 : vector<16x1xf32> to vector<16x32xf32>
    %87 = arith.mulf %80, %86 : vector<16x32xf32>
    %88 = arith.truncf %87 : vector<16x32xf32> to vector<16x32xbf16>
    %c0_27 = arith.constant 0 : index
    %c0_28 = arith.constant 0 : index
    %89 = vector.load %arg4[%c0_27, %c0_28] : memref<32x64xbf16, #tpu.memory_space<vmem>>, vector<32x64xbf16>
    %cst_29 = arith.constant dense<0.000000e+00> : vector<16x64xf32>
    %90 = tpu.matmul %88, %89, %cst_29 {dimension_numbers = #tpu.dot_dimension_numbers<[1], [0], [0], [1], [0, 0, 1, 1], [], []>} : vector<16x32xbf16>, vector<32x64xbf16>, vector<16x64xf32> -> vector<16x64xf32>
    %cst_30 = arith.constant 0.000000e+00 : f32
    %91 = vector.broadcast %cst_30 : f32 to vector<16x64xf32>
    %92 = arith.maximumf %90, %91 : vector<16x64xf32>
    %93 = arith.truncf %92 : vector<16x64xf32> to vector<16x64xbf16>
    %c0_31 = arith.constant 0 : index
    %c0_32 = arith.constant 0 : index
    %94 = vector.load %arg5[%c0_31, %c0_32] : memref<64x32xbf16, #tpu.memory_space<vmem>>, vector<64x32xbf16>
    %cst_33 = arith.constant dense<0.000000e+00> : vector<16x32xf32>
    %95 = tpu.matmul %93, %94, %cst_33 {dimension_numbers = #tpu.dot_dimension_numbers<[1], [0], [0], [1], [0, 0, 1, 1], [], []>} : vector<16x64xbf16>, vector<64x32xbf16>, vector<16x32xf32> -> vector<16x32xf32>
    %96 = arith.addf %95, %69 : vector<16x32xf32>
    %c0_34 = arith.constant 0 : index
    %c0_35 = arith.constant 0 : index
    %97 = vector.load %arg7[%c0_34, %c0_35] : memref<16x32xf32, #tpu.memory_space<vmem>>, vector<16x32xf32>
    tpu.vector_store %arg7[%c0_34, %c0_35], %96 {strides = array<i32>} : memref<16x32xf32, #tpu.memory_space<vmem>>, vector<16x32xf32>,
    return
  }
  func.func @transform_0(%arg0: i32) -> (i32, i32) {
    %c0_i32 = arith.constant 0 : i32
    %c0_i32_0 = arith.constant 0 : i32
    %c0_i32_1 = arith.constant 0 : i32
    return %c0_i32, %c0_i32_0 : i32, i32
  }
  func.func @transform_1(%arg0: i32) -> (i32, i32) {
    %c0_i32 = arith.constant 0 : i32
    %c0_i32_0 = arith.constant 0 : i32
    %c0_i32_1 = arith.constant 0 : i32
    return %c0_i32, %c0_i32_0 : i32, i32
  }
  func.func @transform_2(%arg0: i32) -> (i32, i32, i32) {
    %c0_i32 = arith.constant 0 : i32
    %c0_i32_0 = arith.constant 0 : i32
    %c0_i32_1 = arith.constant 0 : i32
    %c0_i32_2 = arith.constant 0 : i32
    return %c0_i32, %c0_i32_0, %c0_i32_1 : i32, i32, i32
  }
  func.func @transform_3(%arg0: i32) -> (i32, i32) {
    %c0_i32 = arith.constant 0 : i32
    %c0_i32_0 = arith.constant 0 : i32
    %c0_i32_1 = arith.constant 0 : i32
    return %c0_i32, %c0_i32_0 : i32, i32
  }
  func.func @transform_4(%arg0: i32) -> (i32, i32) {
    %c0_i32 = arith.constant 0 : i32
    %c0_i32_0 = arith.constant 0 : i32
    %c0_i32_1 = arith.constant 0 : i32
    return %c0_i32, %c0_i32_0 : i32, i32
  }
  func.func @transform_5(%arg0: i32) -> (i32, i32, i32) {
    %c0_i32 = arith.constant 0 : i32
    %c0_i32_0 = arith.constant 0 : i32
    %c0_i32_1 = arith.constant 0 : i32
    %c0_i32_2 = arith.constant 0 : i32
    return %c0_i32, %c0_i32_0, %c0_i32_1 : i32, i32, i32
  }
  func.func @transform_6(%arg0: i32) -> (i32, i32) {
    %c0_i32 = arith.constant 0 : i32
    %c0_i32_0 = arith.constant 0 : i32
    %c0_i32_1 = arith.constant 0 : i32
    return %c0_i32, %c0_i32_0 : i32, i32
  }
  func.func @transform_7(%arg0: i32) -> (i32, i32, i32, i32) {
    %c0_i32 = arith.constant 0 : i32
    %c0_i32_0 = arith.constant 0 : i32
    %c0_i32_1 = arith.constant 0 : i32
    %c0_i32_2 = arith.constant 0 : i32
    %c0_i32_3 = arith.constant 0 : i32
    return %c0_i32, %c0_i32_0, %c0_i32_1, %c0_i32_2 : i32, i32, i32, i32
  }
}

</mosaic_0001>

<bundles_post_ra>
// kernel: tpu_custom_call.1
= control target key start
LH: loop header
LB: loop body
LE: loop exit
PB: predicated region body
PF: predicated region fallthrough
CT: control target
= control target key end

     0   :  { %13 = vsyncpa [#allocation3], 0  ;;  %s2451_s0 = inlined_call_operand.hbm [shape: f32[16,32], index: 0, kind: input, shape index: {}]   ;;  %s2452_s1 = inlined_call_operand.hbm [shape: bf16[32,128], index: 1, kind: input, shape index: {}]   ;;  %s2453_s2 = inlined_call_operand.hbm [shape: bf16[8,8,32], index: 2, kind: input, shape index: {}]   ;;  %s2454_s3 = inlined_call_operand.hbm [shape: bf16[32,64], index: 3, kind: input, shape index: {}]   ;;  %s2455_s4 = inlined_call_operand.vmem [shape: bf16[64,32], index: 4, kind: input, shape index: {}]   ;;  %s2456_s5 = inlined_call_operand.vmem [shape: f32[8,8,8], index: 5, kind: input, shape index: {}]   ;;  %s2457_s6 = inlined_call_operand.hbm [shape: f32[16,32], index: 6, kind: output, shape index: {0}]   ;;  %s2458_s7 = inlined_call_operand.hbm [shape: f32[2,4,8,8], index: 7, kind: output, shape index: {1}]  }
   0x1   :  { %14 = vsyncpa [#allocation6], 0 }
   0x2   :  { %15 = vsyncpa [#allocation9], 0 }
   0x3   :  { %16 = vsyncpa [#allocation4], 0 }
   0x4   :  { %17 = vsyncpa [#allocation12], 0  ;;  %s2064_s24 = smov [#allocation5]   ;;  %s1922_s28 = scalar_lea.hbm %s2452_s1, 256 }
   0x5   :  { %s35_s25 = sshll.u32 %s2064_s24, 4  ;;  %p1923_p0 = scmp.ne.s32.totalorder %s2452_s1, %s1922_s28  ;;  %s36_s25 = int_to_ptr.vmem [resolvable:$true] %s35_s25 }
   0x6   :  { %p1926_p1 = scmp.lt.u32.totalorder %s1922_s28, %s2452_s1 }
   0x8   :  { %p1928_p2 = pnand %p1926_p1, %p1923_p0 }
   0xa   :  { %1931 = shalt.err (!%p1928_p2)
}
   0xb   :  { %s1932_s10 = scalar_lea.vmem %s36_s25, 256  ;;  %p1937_p4 = scmp.lt.s32.totalorder %s36_s25, %s36_s25 }
   0xc   :  { %p1933_p3 = scmp.ne.s32.totalorder %s36_s25, %s1932_s10  ;;  %p1938_p5 = scmp.lt.s32.totalorder %s1932_s10, %s1932_s10 }
   0xe   :  { %p1939_p6 = por %p1938_p5, %p1937_p4 }
  0x10   :  { %p1940_p7 = pnand %p1939_p6, %p1933_p3 }
  0x12   :  { %1943 = shalt.err (!%p1940_p7)
}
  0x13   :  { %s2065_s11 = smov 64   ;;  %s2066_s12 = smov 4  }
  0x14   :  { %41 = dma.hbm_to_vmem [thread:$0]  %s2452_s1, 256, %s36_s25, [#allocation6], %s2065_s11, %s2065_s11, %s2066_s12  }
  0x15   :  { %s2067_s15 = smov [#allocation2]   ;;  %s1944_s19 = scalar_lea.hbm %s2451_s0, 256 }
  0x16   :  { %s23_s16 = sshll.u32 %s2067_s15, 4  ;;  %p1945_p8 = scmp.ne.s32.totalorder %s2451_s0, %s1944_s19  ;;  %s24_s16 = int_to_ptr.vmem [resolvable:$true] %s23_s16 }
  0x17   :  { %p1948_p9 = scmp.lt.u32.totalorder %s1944_s19, %s2451_s0 }
  0x19   :  { %p1950_p10 = pnand %p1948_p9, %p1945_p8 }
  0x1b   :  { %1953 = shalt.err (!%p1950_p10)
}
  0x1c   :  { %s1954_s24 = scalar_lea.vmem %s24_s16, 256  ;;  %p1959_p12 = scmp.lt.s32.totalorder %s24_s16, %s24_s16 }
  0x1d   :  { %p1955_p11 = scmp.ne.s32.totalorder %s24_s16, %s1954_s24  ;;  %p1960_p13 = scmp.lt.s32.totalorder %s1954_s24, %s1954_s24 }
  0x1f   :  { %p1961_p0 = por %p1960_p13, %p1959_p12 }
  0x21   :  { %p1962_p1 = pnand %p1961_p0, %p1955_p11 }
  0x23   :  { %1965 = shalt.err (!%p1962_p1)
}
  0x24   :  { %s2068_s1 = smov 128   ;;  %s2069_s25 = smov 8  }
  0x25   :  { %29 = dma.hbm_to_vmem [thread:$0]  %s2451_s0, 256, %s24_s16, [#allocation3], %s2068_s1, %s2068_s1, %s2069_s25  }
  0x26   :  { %s2070_s28 = smov [#allocation7]   ;;  %s2071_s30 = smov [#allocation8]  }
  0x27   :  { %s47_s29 = sshll.u32 %s2070_s28, 4  ;;  %s59_s8 = sshll.u32 %s2071_s30, 4  ;;  %s48_s29 = int_to_ptr.vmem [resolvable:$true] %s47_s29  ;;  %s2150_s8 = int_to_ptr.vmem [resolvable:$true] %s59_s8 }
  0x28   :  { %s1966_s13 = scalar_lea.hbm %s2453_s2, 512 }
  0x29   :  { %p1967_p2 = scmp.ne.s32.totalorder %s2453_s2, %s1966_s13  ;;  %p1970_p3 = scmp.lt.u32.totalorder %s1966_s13, %s2453_s2 }
  0x2b   :  { %p1972_p4 = pnand %p1970_p3, %p1967_p2 }
  0x2d   :  { %1975 = shalt.err (!%p1972_p4)
}
  0x2e   :  { %s1976_s0 = scalar_lea.vmem %s48_s29, 512  ;;  %p1981_p6 = scmp.lt.s32.totalorder %s48_s29, %s48_s29 }
  0x2f   :  { %p1977_p5 = scmp.ne.s32.totalorder %s48_s29, %s1976_s0  ;;  %p1982_p7 = scmp.lt.s32.totalorder %s1976_s0, %s1976_s0 }
  0x31   :  { %p1983_p8 = por %p1982_p7, %p1981_p6 }
  0x33   :  { %p1984_p9 = pnand %p1983_p8, %p1977_p5 }
  0x35   :  { %1987 = shalt.err (!%p1984_p9)
}
  0x36   :  { %53 = dma.hbm_to_vmem [thread:$0]  %s2453_s2, 512, %s48_s29, [#allocation6], %s2065_s11, %s2065_s11, %s2066_s12  }
  0x37   :  { %s1988_s22 = scalar_lea.hbm %s2454_s3, 256 }
  0x38   :  { %p1989_p10 = scmp.ne.s32.totalorder %s2454_s3, %s1988_s22  ;;  %p1992_p11 = scmp.lt.u32.totalorder %s1988_s22, %s2454_s3 }
  0x3a   :  { %p1994_p12 = pnand %p1992_p11, %p1989_p10 }
  0x3c   :  { %1997 = shalt.err (!%p1994_p12)
}
  0x3d   :  { %s1998_s28 = scalar_lea.vmem %s2150_s8, 256  ;;  %p2003_p0 = scmp.lt.s32.totalorder %s2150_s8, %s2150_s8 }
  0x3e   :  { %p1999_p13 = scmp.ne.s32.totalorder %s2150_s8, %s1998_s28  ;;  %p2004_p1 = scmp.lt.s32.totalorder %s1998_s28, %s1998_s28 }
  0x40   :  { %p2005_p2 = por %p2004_p1, %p2003_p0 }
  0x42   :  { %p2006_p3 = pnand %p2005_p2, %p1999_p13 }
  0x44   :  { %2009 = shalt.err (!%p2006_p3)
}
  0x45   :  { %65 = dma.hbm_to_vmem [thread:$0]  %s2454_s3, 256, %s2150_s8, [#allocation9], %s2065_s11, %s2065_s11, %s2066_s12  }
  0x46   :  { %2054 = dma.done.wait [#allocation3], 256  }
  0x47   :  { %2055 = vsyncadd [#allocation3], 4294967040 }
  0x48   :  { %2056 = dma.done.wait [#allocation6], 768  }
  0x49   :  { %2057 = vsyncadd [#allocation6], 4294966528 }
  0x4a   :  { %2058 = dma.done.wait [#allocation9], 256  }
  0x4b   :  { %2059 = vsyncadd [#allocation9], 4294967040  ;;  %vm85_vm0 = vcmask 261120   ;;  %v2187_v0 = vld [vmem:[#allocation2] sm:$0xff]  ;;  %v2189_v1 = vld [vmem:[#allocation2 + $0x8] sm:$0xff]  ;;  %v2072_v9 = vmov 0.0  }
  0x4c   :  { %v86_v2 = vsel %vm85_vm0, %v2187_v0, 0.0  ;;  %v95_v3 = vmul.f32 %v2187_v0, %v2187_v0  ;;  %v89_v4 = vsel %vm85_vm0, %v2189_v1, 0.0  ;;  %v96_v5 = vmul.f32 %v2189_v1, %v2189_v1  ;;  %v1906_v8 = vld [vmem:[#allocation5] sm:$0xff]   ;;  %1718 = vmatprep.subr.bf16.mxu1 %v2072_v9  ;;  %v1907_v10 = vld [vmem:[#allocation5 + $0x8] sm:$0xff]   ;;  %1732 = vmatprep.subr.bf16.mxu0 %v2072_v9  ;;  %s2074_s3 = smov 112   ;;  %s2075_s12 = smov 120  }
  0x4d   :  { %87 = vadd.xlane.f32.xlu0 %v86_v2  ;;  %vm2073_vm1 = vmmov 0   ;;  %1719 = vmatpush3.bf16.msra.mxu1 %v1906_v8  ;;  %s2076_s30 = smov 104   ;;  %s2077_s8 = smov 96   ;;  %vm209_vm2 = vcmask 64512   ;;  %vm636_vm3 = vcmask 1043456   ;;  %v599_v8 = vld [vmem:[%s2456_s5] sm:$0xff] }
  0x4e   :  { %v97_v6 = vsel %vm85_vm0, %v95_v3, 0.0  ;;  %v100_v7 = vsel %vm85_vm0, %v96_v5, 0.0  ;;  %1722 = vmatprep.mubr.msk.bf16.mxu1 %vm2073_vm1, %v2072_v9  ;;  %1720 = vmatprep.subr.bf16.mxu1 %v2072_v9  ;;  %vm1542_vm4 = vcmask 523264  }
  0x4f   :  { %98 = vadd.xlane.f32.xlu1 %v97_v6  ;;  %1734 = vmatprep.mubr.msk.bf16.mxu0 %vm2073_vm1, %v2072_v9 }
  0x51   :  { %90 = vadd.xlane.f32.xlu0 %v89_v4  ;;  %1721 = vmatpush3.bf16.msra.mxu1 %v1907_v10 }
  0x52   :  { %1726 = vmatprep.subr.bf16.mxu1 %v2072_v9 }
  0x53   :  { %101 = vadd.xlane.f32.xlu1 %v100_v7 }
  0xda   :  { %v88_v11 = vpop.xlane.xlu0 %87 }
  0xdb   :  { %v93_v12 = vmul.f32 0.03125, %v88_v11 }
  0xdc   :  { %v99_v13 = vpop.xlane.xlu1 %98 }
  0xdd   :  { %v107_v14 = vmul.f32 %v93_v12, %v93_v12  ;;  %v103_v15 = vmul.f32 0.03125, %v99_v13  ;;  %v105_v26 = vsub.f32 %v2187_v0, %v93_v12 }
  0xde   :  { %v91_v16 = vpop.xlane.xlu0 %90 }
  0xdf   :  { %v109_v17 = vsub.f32 %v103_v15, %v107_v14  ;;  %v94_v18 = vmul.f32 0.03125, %v91_v16 }
  0xe0   :  { %v102_v19 = vpop.xlane.xlu1 %101 }
  0xe1   :  { %v111_v20 = vadd.f32 1e-05, %v109_v17  ;;  %v108_v21 = vmul.f32 %v94_v18, %v94_v18  ;;  %v104_v22 = vmul.f32 0.03125, %v102_v19  ;;  %v106_v27 = vsub.f32 %v2189_v1, %v94_v18  ;;  %v600_v18 = vld [vmem:[%s2456_s5 + $0x8] sm:$0xff]  ;;  %v601_v19 = vld [vmem:[%s2456_s5 + $0x10] sm:$0xff] }
  0xe3   :  { %v110_v23 = vsub.f32 %v104_v22, %v108_v21  ;;  %1914 = vrsqrt.f32 %v111_v20 }
  0xe5   :  { %v112_v24 = vadd.f32 1e-05, %v110_v23 }
  0xe7   :  { %1916 = vrsqrt.f32 %v112_v24 }
  0xed   :  { %v1915_v25 = vpop.eup %1914 }
  0xee   :  { %v115_v29 = vmul.f32 %v1915_v25, %v105_v26 }
  0xf1   :  { %v1917_v28 = vpop.eup %1916 }
  0xf2   :  { %v116_v30 = vmul.f32 %v1917_v28, %v106_v27 }
  0xf4   :  { %v117_v31 = vpack.c.bf16 %v116_v30, %v115_v29 }
  0xf6   :  { %1723 = vmatmul.mubr.msk.bf16.vlgmr.msra.gmra.mrb[0].mxu1 %vm85_vm0, %v117_v31 }
  0xf7   :  { %1728 = vmatprep.mubr.msk.bf16.mxu1 %vm2073_vm1, %v2072_v9 }
 0x1c9   :  { %v171_v32 = vpop.f32.mrb[0].mxu1 }
 0x1ca   :  { %186 = vrot.lane.b32.xlu1 %v171_v32, %s2074_s3  ;;  %180 = vrot.lane.b32.xlu0 %v171_v32, %s2075_s12  ;;  %v1724_v33 = vpop.f32.mrb[1].mxu1  ;;  %v198_v36 = vpack.c.bf16 %v171_v32, %v171_v32 }
 0x1cb   :  { %v174_v34 = vpop.f32.mrb[2].mxu1 }
 0x1cc   :  { %v1725_v35 = vpop.f32.mrb[3].mxu1  ;;  %v202_v44 = vpack.c.bf16 %v174_v34, %v174_v34 }
 0x1ce   :  { %192 = vrot.lane.b32.xlu1 %v171_v32, %s2076_s30  ;;  %188 = vrot.lane.b32.xlu0 %v174_v34, %s2074_s3 }
 0x1d2   :  { %207 = vrot.lane.b32.xlu0 %v198_v36, %s2077_s8  ;;  %182 = vrot.lane.b32.xlu1 %v174_v34, %s2075_s12 }
 0x1d6   :  { %194 = vrot.lane.b32.xlu1 %v174_v34, %s2076_s30  ;;  %s2078_s30 = smov [#allocation11]  }
 0x23c   :  { %v187_v37 = vpop.permute.xlu1 %186  ;;  %v181_v38 = vpop.permute.xlu0 %180 }
 0x23d   :  { %v200_v39 = vpack.c.bf16 %v187_v37, %v187_v37  ;;  %v199_v40 = vpack.c.bf16 %v181_v38, %v181_v38  ;;  %v603_v37 = vld [vmem:[%s2456_s5 + $0x20] sm:$0xff] }
 0x23f   :  { %306 = vrot.lane.b32.xlu0 %v200_v39, %s2077_s8  ;;  %257 = vrot.lane.b32.xlu1 %v199_v40, %s2077_s8 }
 0x240   :  { %v193_v41 = vpop.permute.xlu1 %192  ;;  %v189_v42 = vpop.permute.xlu0 %188 }
 0x241   :  { %v201_v43 = vpack.c.bf16 %v193_v41, %v193_v41  ;;  %v204_v47 = vpack.c.bf16 %v189_v42, %v189_v42 }
 0x243   :  { %355 = vrot.lane.b32.xlu1 %v201_v43, %s2077_s8  ;;  %404 = vrot.lane.b32.xlu0 %v202_v44, %s2077_s8 }
 0x244   :  { %v208_v45 = vpop.permute.xlu0 %207  ;;  %v183_v46 = vpop.permute.xlu1 %182 }
 0x245   :  { %v214_v48 = vsel %vm209_vm2, %v208_v45, 0  ;;  %v203_v49 = vpack.c.bf16 %v183_v46, %v183_v46 }
 0x246   :  { %1727 = vmatpush3.bf16.xpose.msra.mxu1 %v214_v48 }
 0x247   :  { %453 = vrot.lane.b32.xlu1 %v203_v49, %s2077_s8  ;;  %502 = vrot.lane.b32.xlu0 %v204_v47, %s2077_s8 }
 0x248   :  { %v195_v50 = vpop.permute.xlu1 %194  ;;  %1738 = vmatprep.subr.bf16.mxu1 %v2072_v9 }
 0x249   :  { %v205_v51 = vpack.c.bf16 %v195_v50, %v195_v50 }
 0x24b   :  { %551 = vrot.lane.b32.xlu1 %v205_v51, %s2077_s8  ;;  %631 = vrot.lane.b32.xlu0 %v198_v36, %s2065_s11  ;;  %s1606_s8 = sshll.u32 %s2078_s30, 4  ;;  %s1607_s8 = int_to_ptr.vmem [resolvable:$true] %s1606_s8 }
 0x24c   :  { %p2015_p5 = scmp.lt.s32.totalorder %s1607_s8, %s1607_s8 }
 0x24d   :  { %1729 = vmatmul.mubr.msk.bf16.vlgmr.msra.gmra.mrb[4].mxu1 %vm209_vm2, %v198_v36  ;;  %v602_v36 = vld [vmem:[%s2456_s5 + $0x18] sm:$0xff] }
 0x24e   :  { %1740 = vmatprep.mubr.msk.bf16.mxu1 %vm2073_vm1, %v2072_v9 }
 0x24f   :  { %680 = vrot.lane.b32.xlu1 %v199_v40, %s2065_s11  ;;  %728 = vrot.lane.b32.xlu0 %v200_v39, %s2065_s11 }
 0x253   :  { %776 = vrot.lane.b32.xlu1 %v201_v43, %s2065_s11  ;;  %824 = vrot.lane.b32.xlu0 %v202_v44, %s2065_s11 }
 0x257   :  { %872 = vrot.lane.b32.xlu1 %v203_v49, %s2065_s11  ;;  %920 = vrot.lane.b32.xlu0 %v204_v47, %s2065_s11 }
 0x25b   :  { %968 = vrot.lane.b32.xlu1 %v205_v51, %s2065_s11  ;;  %s2010_s11 = scalar_lea.vmem %s1607_s8, 1024 }
 0x25c   :  { %p2011_p4 = scmp.ne.s32.totalorder %s1607_s8, %s2010_s11  ;;  %p2016_p6 = scmp.lt.s32.totalorder %s2010_s11, %s2010_s11 }
 0x25e   :  { %p2017_p7 = por %p2016_p6, %p2015_p5 }
 0x260   :  { %p2018_p8 = pnand %p2017_p7, %p2011_p4 }
 0x2b1   :  { %v307_v52 = vpop.permute.xlu0 %306  ;;  %v258_v53 = vpop.permute.xlu1 %257 }
 0x2b2   :  { %v312_v54 = vsel %vm209_vm2, %v307_v52, 0  ;;  %v263_v55 = vsel %vm209_vm2, %v258_v53, 0 }
 0x2b3   :  { %1733 = vmatpush3.bf16.xpose.msra.mxu0 %v263_v55  ;;  %1739 = vmatpush3.bf16.xpose.msra.mxu1 %v312_v54  ;;  %v604_v54 = vld [vmem:[%s2456_s5 + $0x28] sm:$0xff]  ;;  %v605_v55 = vld [vmem:[%s2456_s5 + $0x30] sm:$0xff] }
 0x2b4   :  { %1744 = vmatprep.subr.bf16.mxu0 %v2072_v9  ;;  %1750 = vmatprep.subr.bf16.mxu1 %v2072_v9 }
 0x2b5   :  { %v356_v56 = vpop.permute.xlu1 %355  ;;  %v405_v57 = vpop.permute.xlu0 %404 }
 0x2b6   :  { %v361_v58 = vsel %vm209_vm2, %v356_v56, 0  ;;  %v410_v59 = vsel %vm209_vm2, %v405_v57, 0 }
 0x2b9   :  { %v454_v60 = vpop.permute.xlu1 %453  ;;  %v503_v61 = vpop.permute.xlu0 %502 }
 0x2ba   :  { %1735 = vmatmul.mubr.msk.bf16.vlgmr.msra.gmra.mrb[0].mxu0 %vm209_vm2, %v199_v40  ;;  %1741 = vmatmul.mubr.msk.bf16.vlgmr.msra.gmra.mrb[8].mxu1 %vm209_vm2, %v200_v39  ;;  %v459_v62 = vsel %vm209_vm2, %v454_v60, 0  ;;  %v508_v63 = vsel %vm209_vm2, %v503_v61, 0 }
 0x2bb   :  { %1745 = vmatpush3.bf16.xpose.msra.mxu0 %v361_v58  ;;  %1751 = vmatpush3.bf16.xpose.msra.mxu1 %v410_v59 }
 0x2bc   :  { %1746 = vmatprep.mubr.msk.bf16.mxu0 %vm2073_vm1, %v2072_v9  ;;  %1752 = vmatprep.mubr.msk.bf16.mxu1 %vm2073_vm1, %v2072_v9 }
 0x2bd   :  { %1756 = vmatprep.subr.bf16.mxu0 %v2072_v9  ;;  %1762 = vmatprep.subr.bf16.mxu1 %v2072_v9  ;;  %v552_v2 = vpop.permute.xlu1 %551  ;;  %v632_v3 = vpop.permute.xlu0 %631 }
 0x2be   :  { %v557_v4 = vsel %vm209_vm2, %v552_v2, 0  ;;  %v638_v5 = vsel %vm636_vm3, %v632_v3, 0 }
 0x2c1   :  { %v681_v6 = vpop.permute.xlu1 %680  ;;  %v729_v13 = vpop.permute.xlu0 %728 }
 0x2c2   :  { %1747 = vmatmul.mubr.msk.bf16.vlgmr.msra.gmra.mrb[4].mxu0 %vm209_vm2, %v201_v43  ;;  %1753 = vmatmul.mubr.msk.bf16.vlgmr.msra.gmra.mrb[12].mxu1 %vm209_vm2, %v202_v44  ;;  %v686_v7 = vsel %vm636_vm3, %v681_v6, 0  ;;  %v734_v17 = vsel %vm636_vm3, %v729_v13, 0  ;;  %v1025_v13 = vld [vmem:[#allocation7 + $0x4] sm:$0xf] }
 0x2c3   :  { %1757 = vmatpush3.bf16.xpose.msra.mxu0 %v459_v62  ;;  %1763 = vmatpush3.bf16.xpose.msra.mxu1 %v508_v63  ;;  %v1024_v63 = vld [vmem:[#allocation7] sm:$0xf] }
 0x2c4   :  { %1758 = vmatprep.mubr.msk.bf16.mxu0 %vm2073_vm1, %v2072_v9  ;;  %1764 = vmatprep.mubr.msk.bf16.mxu1 %vm2073_vm1, %v2072_v9 }
 0x2c5   :  { %1768 = vmatprep.subr.bf16.mxu0 %v2072_v9  ;;  %1774 = vmatprep.subr.bf16.mxu1 %v2072_v9  ;;  %v777_v20 = vpop.permute.xlu1 %776  ;;  %v825_v21 = vpop.permute.xlu0 %824 }
 0x2c6   :  { %v782_v34 = vsel %vm636_vm3, %v777_v20, 0  ;;  %v830_v35 = vsel %vm636_vm3, %v825_v21, 0  ;;  %v1026_v20 = vld [vmem:[#allocation7 + $0x8] sm:$0xf] }
 0x2c9   :  { %v873_v38 = vpop.permute.xlu1 %872  ;;  %v921_v39 = vpop.permute.xlu0 %920 }
 0x2ca   :  { %1759 = vmatmul.mubr.msk.bf16.vlgmr.msra.gmra.mrb[8].mxu0 %vm209_vm2, %v203_v49  ;;  %1765 = vmatmul.mubr.msk.bf16.vlgmr.msra.gmra.mrb[16].mxu1 %vm209_vm2, %v204_v47  ;;  %v878_v52 = vsel %vm636_vm3, %v873_v38, 0  ;;  %v926_v53 = vsel %vm636_vm3, %v921_v39, 0 }
 0x2cb   :  { %1769 = vmatpush3.bf16.xpose.msra.mxu0 %v557_v4  ;;  %1775 = vmatpush3.bf16.msra.mxu1 %v638_v5 }
 0x2cc   :  { %1770 = vmatprep.mubr.msk.bf16.mxu0 %vm2073_vm1, %v2072_v9  ;;  %1780 = vmatprep.subr.bf16.mxu0 %v2072_v9 }
 0x2cd   :  { %1776 = vmatprep.mubr.msk.bf16.mxu1 %vm2073_vm1, %v2072_v9  ;;  %1786 = vmatprep.subr.bf16.mxu1 %v2072_v9  ;;  %v969_v56 = vpop.permute.xlu1 %968 }
 0x2d2   :  { %1771 = vmatmul.mubr.msk.bf16.vlgmr.msra.gmra.mrb[12].mxu0 %vm209_vm2, %v205_v51 }
 0x2d3   :  { %1781 = vmatpush3.bf16.msra.mxu0 %v686_v7  ;;  %1782 = vmatprep.mubr.msk.bf16.mxu0 %vm2073_vm1, %v2072_v9 }
 0x2d4   :  { %1792 = vmatprep.subr.bf16.mxu0 %v2072_v9 }
 0x320   :  { %v250_v10 = vpop.f32.mrb[4].mxu1 }
 0x321   :  { %v607_v11 = vmul.f32 %v599_v8, %v250_v10  ;;  %v1730_v12 = vpop.f32.mrb[5].mxu1  ;;  %v1036_v8 = vsel %vm636_vm3, %v1024_v63, 0  ;;  %v974_v10 = vsel %vm636_vm3, %v969_v56, 0 }
 0x322   :  { %v253_v14 = vpop.f32.mrb[6].mxu1 }
 0x323   :  { %615 = vst.msk [vmem:[#allocation11] sm:$0xff] %vm209_vm2, %v607_v11  ;;  %v623_v15 = vpack.c.bf16 %v607_v11, %v607_v11  ;;  %v1731_v16 = vpop.f32.mrb[7].mxu1  ;;  %v606_v11 = vld [vmem:[%s2456_s5 + $0x38] sm:$0xff] }
 0x325   :  { %1777 = vmatmul.mubr.msk.bf16.vlgmr.msra.gmra.mrb[20].mxu1 %vm209_vm2, %v623_v15 }
 0x326   :  { %1787 = vmatpush3.bf16.msra.mxu1 %v734_v17  ;;  %1788 = vmatprep.mubr.msk.bf16.mxu1 %vm2073_vm1, %v2072_v9 }
 0x327   :  { %1798 = vmatprep.subr.bf16.mxu1 %v2072_v9 }
 0x38d   :  { %v299_v22 = vpop.f32.mrb[0].mxu0  ;;  %v348_v23 = vpop.f32.mrb[8].mxu1 }
 0x38e   :  { %v608_v24 = vmul.f32 %v600_v18, %v299_v22  ;;  %v609_v25 = vmul.f32 %v601_v19, %v348_v23  ;;  %v1736_v26 = vpop.f32.mrb[1].mxu0  ;;  %v1742_v27 = vpop.f32.mrb[9].mxu1  ;;  %v1082_v19 = vsel %vm636_vm3, %v1025_v13, 0 }
 0x38f   :  { %v302_v28 = vpop.f32.mrb[2].mxu0  ;;  %v351_v29 = vpop.f32.mrb[10].mxu1  ;;  %v1027_v27 = vld [vmem:[#allocation7 + $0xc] sm:$0xf] }
 0x390   :  { %616 = vst.msk [vmem:[#allocation11 + $0x8] sm:$0xff] %vm209_vm2, %v608_v24  ;;  %v624_v30 = vpack.c.bf16 %v608_v24, %v608_v24  ;;  %617 = vst.msk [vmem:[#allocation11 + $0x10] sm:$0xff] %vm209_vm2, %v609_v25  ;;  %v625_v31 = vpack.c.bf16 %v609_v25, %v609_v25  ;;  %v1737_v32 = vpop.f32.mrb[3].mxu0  ;;  %v1743_v33 = vpop.f32.mrb[11].mxu1  ;;  %v1128_v24 = vsel %vm636_vm3, %v1026_v20, 0 }
 0x391   :  { %v1028_v28 = vld [vmem:[#allocation7 + $0x10] sm:$0xf] }
 0x392   :  { %1783 = vmatmul.mubr.msk.bf16.vlgmr.msra.gmra.mrb[16].mxu0 %vm209_vm2, %v624_v30  ;;  %1789 = vmatmul.mubr.msk.bf16.vlgmr.msra.gmra.mrb[24].mxu1 %vm209_vm2, %v625_v31 }
 0x393   :  { %1793 = vmatpush3.bf16.msra.mxu0 %v782_v34  ;;  %1799 = vmatpush3.bf16.msra.mxu1 %v830_v35  ;;  %v1174_v35 = vsel %vm636_vm3, %v1027_v27, 0 }
 0x394   :  { %1794 = vmatprep.mubr.msk.bf16.mxu0 %vm2073_vm1, %v2072_v9  ;;  %1800 = vmatprep.mubr.msk.bf16.mxu1 %vm2073_vm1, %v2072_v9 }
 0x395   :  { %v397_v40 = vpop.f32.mrb[4].mxu0  ;;  %v446_v41 = vpop.f32.mrb[12].mxu1  ;;  %1804 = vmatprep.subr.bf16.mxu0 %v2072_v9  ;;  %1810 = vmatprep.subr.bf16.mxu1 %v2072_v9 }
 0x396   :  { %v610_v42 = vmul.f32 %v602_v36, %v397_v40  ;;  %v611_v43 = vmul.f32 %v603_v37, %v446_v41  ;;  %v1748_v44 = vpop.f32.mrb[5].mxu0  ;;  %v1754_v45 = vpop.f32.mrb[13].mxu1  ;;  %v1220_v36 = vsel %vm636_vm3, %v1028_v28, 0  ;;  %v1029_v41 = vld [vmem:[#allocation7 + $0x14] sm:$0xf] }
 0x397   :  { %v400_v46 = vpop.f32.mrb[6].mxu0  ;;  %v449_v47 = vpop.f32.mrb[14].mxu1 }
 0x398   :  { %618 = vst.msk [vmem:[#allocation11 + $0x18] sm:$0xff] %vm209_vm2, %v610_v42  ;;  %v626_v48 = vpack.c.bf16 %v610_v42, %v610_v42  ;;  %619 = vst.msk [vmem:[#allocation11 + $0x20] sm:$0xff] %vm209_vm2, %v611_v43  ;;  %v627_v49 = vpack.c.bf16 %v611_v43, %v611_v43  ;;  %v1749_v50 = vpop.f32.mrb[7].mxu0  ;;  %v1755_v51 = vpop.f32.mrb[15].mxu1  ;;  %v1030_v42 = vld [vmem:[#allocation7 + $0x18] sm:$0xf] }
 0x399   :  { %v1312_v50 = vsel %vm636_vm3, %v1030_v42, 0 }
 0x39a   :  { %1795 = vmatmul.mubr.msk.bf16.vlgmr.msra.gmra.mrb[20].mxu0 %vm209_vm2, %v626_v48  ;;  %1801 = vmatmul.mubr.msk.bf16.vlgmr.msra.gmra.mrb[28].mxu1 %vm209_vm2, %v627_v49  ;;  %v1266_v49 = vsel %vm636_vm3, %v1029_v41, 0 }
 0x39b   :  { %1805 = vmatpush3.bf16.msra.mxu0 %v878_v52  ;;  %1811 = vmatpush3.bf16.msra.mxu1 %v926_v53 }
 0x39c   :  { %1806 = vmatprep.mubr.msk.bf16.mxu0 %vm2073_vm1, %v2072_v9  ;;  %1812 = vmatprep.mubr.msk.bf16.mxu1 %vm2073_vm1, %v2072_v9 }
 0x39d   :  { %v495_v57 = vpop.f32.mrb[8].mxu0  ;;  %v544_v58 = vpop.f32.mrb[16].mxu1  ;;  %1816 = vmatprep.subr.bf16.mxu0 %v2072_v9  ;;  %1822 = vmatprep.subr.bf16.mxu1 %v2072_v9 }
 0x39e   :  { %v612_v59 = vmul.f32 %v604_v54, %v495_v57  ;;  %v613_v60 = vmul.f32 %v605_v55, %v544_v58  ;;  %v1760_v61 = vpop.f32.mrb[9].mxu0  ;;  %v1766_v62 = vpop.f32.mrb[17].mxu1  ;;  %v1031_v55 = vld [vmem:[#allocation7 + $0x1c] sm:$0xf] }
 0x39f   :  { %v498_v2 = vpop.f32.mrb[10].mxu0  ;;  %v547_v3 = vpop.f32.mrb[18].mxu1  ;;  %v1358_v62 = vsel %vm636_vm3, %v1031_v55, 0 }
 0x3a0   :  { %620 = vst.msk [vmem:[#allocation11 + $0x28] sm:$0xff] %vm209_vm2, %v612_v59  ;;  %v628_v4 = vpack.c.bf16 %v612_v59, %v612_v59  ;;  %621 = vst.msk [vmem:[#allocation11 + $0x30] sm:$0xff] %vm209_vm2, %v613_v60  ;;  %v629_v5 = vpack.c.bf16 %v613_v60, %v613_v60  ;;  %v1761_v6 = vpop.f32.mrb[11].mxu0  ;;  %v1767_v7 = vpop.f32.mrb[19].mxu1 }
 0x3a2   :  { %1807 = vmatmul.mubr.msk.bf16.vlgmr.msra.gmra.mrb[24].mxu0 %vm209_vm2, %v628_v4  ;;  %1813 = vmatmul.mubr.msk.bf16.vlgmr.msra.gmra.mrb[32].mxu1 %vm209_vm2, %v629_v5 }
 0x3a3   :  { %1817 = vmatpush3.bf16.msra.mxu0 %v974_v10  ;;  %1818 = vmatprep.mubr.msk.bf16.mxu0 %vm2073_vm1, %v2072_v9 }
 0x3a4   :  { %1823 = vmatpush3.bf16.msra.mxu1 %v1036_v8  ;;  %1824 = vmatprep.mubr.msk.bf16.mxu1 %vm2073_vm1, %v2072_v9 }
 0x3a5   :  { %v593_v12 = vpop.f32.mrb[12].mxu0  ;;  %1828 = vmatprep.subr.bf16.mxu0 %v2072_v9  ;;  %1834 = vmatprep.subr.bf16.mxu1 %v2072_v9 }
 0x3a6   :  { %v614_v14 = vmul.f32 %v606_v11, %v593_v12  ;;  %v1772_v15 = vpop.f32.mrb[13].mxu0 }
 0x3a7   :  { %v596_v16 = vpop.f32.mrb[14].mxu0 }
 0x3a8   :  { %622 = vst.msk [vmem:[#allocation11 + $0x38] sm:$0xff] %vm209_vm2, %v614_v14  ;;  %v630_v17 = vpack.c.bf16 %v614_v14, %v614_v14  ;;  %v1773_v18 = vpop.f32.mrb[15].mxu0 }
 0x3aa   :  { %1819 = vmatmul.mubr.msk.bf16.vlgmr.msra.gmra.mrb[28].mxu0 %vm209_vm2, %v630_v17 }
 0x3ab   :  { %1829 = vmatpush3.bf16.msra.mxu0 %v1082_v19  ;;  %1830 = vmatprep.mubr.msk.bf16.mxu0 %vm2073_vm1, %v2072_v9 }
 0x3ac   :  { %1840 = vmatprep.subr.bf16.mxu0 %v2072_v9 }
 0x3f8   :  { %v674_v21 = vpop.f32.mrb[20].mxu1 }
 0x3f9   :  { %v1016_v22 = vpack.c.bf16 %v674_v21, %v674_v21  ;;  %v1778_v23 = vpop.f32.mrb[21].mxu1 }
 0x3fa   :  { %v677_v25 = vpop.f32.mrb[22].mxu1 }
 0x3fb   :  { %v1779_v26 = vpop.f32.mrb[23].mxu1  ;;  %1825 = vmatmul.mubr.msk.bf16.vlgmr.msra.gmra.mrb[36].mxu1 %vm209_vm2, %v1016_v22 }
 0x3fc   :  { %1835 = vmatpush3.bf16.msra.mxu1 %v1128_v24  ;;  %1836 = vmatprep.mubr.msk.bf16.mxu1 %vm2073_vm1, %v2072_v9 }
 0x3fd   :  { %1846 = vmatprep.subr.bf16.mxu1 %v2072_v9 }
 0x465   :  { %v722_v29 = vpop.f32.mrb[16].mxu0  ;;  %v770_v30 = vpop.f32.mrb[24].mxu1 }
 0x466   :  { %v1017_v31 = vpack.c.bf16 %v722_v29, %v722_v29  ;;  %v1018_v32 = vpack.c.bf16 %v770_v30, %v770_v30  ;;  %v1784_v33 = vpop.f32.mrb[17].mxu0  ;;  %v1790_v34 = vpop.f32.mrb[25].mxu1 }
 0x467   :  { %v725_v37 = vpop.f32.mrb[18].mxu0  ;;  %v773_v38 = vpop.f32.mrb[26].mxu1 }
 0x468   :  { %v1785_v39 = vpop.f32.mrb[19].mxu0  ;;  %v1791_v40 = vpop.f32.mrb[27].mxu1  ;;  %1831 = vmatmul.mubr.msk.bf16.vlgmr.msra.gmra.mrb[32].mxu0 %vm209_vm2, %v1017_v31  ;;  %1837 = vmatmul.mubr.msk.bf16.vlgmr.msra.gmra.mrb[40].mxu1 %vm209_vm2, %v1018_v32 }
 0x469   :  { %1841 = vmatpush3.bf16.msra.mxu0 %v1174_v35  ;;  %1847 = vmatpush3.bf16.msra.mxu1 %v1220_v36 }
 0x46a   :  { %1842 = vmatprep.mubr.msk.bf16.mxu0 %vm2073_vm1, %v2072_v9  ;;  %1848 = vmatprep.mubr.msk.bf16.mxu1 %vm2073_vm1, %v2072_v9 }
 0x46b   :  { %1852 = vmatprep.subr.bf16.mxu0 %v2072_v9  ;;  %1858 = vmatprep.subr.bf16.mxu1 %v2072_v9 }
 0x46d   :  { %v818_v43 = vpop.f32.mrb[20].mxu0  ;;  %v866_v44 = vpop.f32.mrb[28].mxu1 }
 0x46e   :  { %v1019_v45 = vpack.c.bf16 %v818_v43, %v818_v43  ;;  %v1020_v46 = vpack.c.bf16 %v866_v44, %v866_v44  ;;  %v1796_v47 = vpop.f32.mrb[21].mxu0  ;;  %v1802_v48 = vpop.f32.mrb[29].mxu1 }
 0x46f   :  { %v821_v51 = vpop.f32.mrb[22].mxu0  ;;  %v869_v52 = vpop.f32.mrb[30].mxu1 }
 0x470   :  { %v1797_v53 = vpop.f32.mrb[23].mxu0  ;;  %v1803_v54 = vpop.f32.mrb[31].mxu1  ;;  %1843 = vmatmul.mubr.msk.bf16.vlgmr.msra.gmra.mrb[36].mxu0 %vm209_vm2, %v1019_v45  ;;  %1849 = vmatmul.mubr.msk.bf16.vlgmr.msra.gmra.mrb[44].mxu1 %vm209_vm2, %v1020_v46 }
 0x471   :  { %1853 = vmatpush3.bf16.msra.mxu0 %v1266_v49  ;;  %1859 = vmatpush3.bf16.msra.mxu1 %v1312_v50 }
 0x472   :  { %1854 = vmatprep.mubr.msk.bf16.mxu0 %vm2073_vm1, %v2072_v9  ;;  %1860 = vmatprep.mubr.msk.bf16.mxu1 %vm2073_vm1, %v2072_v9 }
 0x473   :  { %1864 = vmatprep.subr.bf16.mxu0 %v2072_v9  ;;  %1870 = vmatprep.subr.bf16.mxu1 %v2072_v9 }
 0x475   :  { %v914_v56 = vpop.f32.mrb[24].mxu0  ;;  %v962_v57 = vpop.f32.mrb[32].mxu1 }
 0x476   :  { %v1021_v58 = vpack.c.bf16 %v914_v56, %v914_v56  ;;  %v1022_v59 = vpack.c.bf16 %v962_v57, %v962_v57  ;;  %v1808_v60 = vpop.f32.mrb[25].mxu0  ;;  %v1814_v61 = vpop.f32.mrb[33].mxu1 }
 0x477   :  { %v917_v63 = vpop.f32.mrb[26].mxu0  ;;  %v965_v2 = vpop.f32.mrb[34].mxu1 }
 0x478   :  { %v1809_v3 = vpop.f32.mrb[27].mxu0  ;;  %v1815_v4 = vpop.f32.mrb[35].mxu1  ;;  %1855 = vmatmul.mubr.msk.bf16.vlgmr.msra.gmra.mrb[40].mxu0 %vm209_vm2, %v1021_v58  ;;  %1861 = vmatmul.mubr.msk.bf16.vlgmr.msra.gmra.mrb[48].mxu1 %vm209_vm2, %v1022_v59  ;;  %v1908_v2 = vld [vmem:[#allocation8] sm:$0xff]  }
 0x479   :  { %1865 = vmatpush3.bf16.msra.mxu0 %v1358_v62  ;;  %1866 = vmatprep.mubr.msk.bf16.mxu0 %vm2073_vm1, %v2072_v9  ;;  %v1909_v3 = vld [vmem:[#allocation8 + $0x8] sm:$0xff]  }
 0x47a   :  { %1874 = vmatprep.mubr.msk.bf16.mxu1 %vm2073_vm1, %v2072_v9  ;;  %1878 = vmatprep.subr.bf16.mxu0 %v2072_v9  ;;  %v1911_v4 = vld [vmem:[%s2455_s4 + $0x8] sm:$0xff]  }
 0x47b   :  { %1871 = vmatpush3.bf16.msra.mxu1 %v1908_v2 }
 0x47c   :  { %1872 = vmatprep.subr.bf16.mxu1 %v2072_v9 }
 0x47d   :  { %v1010_v5 = vpop.f32.mrb[28].mxu0 }
 0x47e   :  { %v1023_v6 = vpack.c.bf16 %v1010_v5, %v1010_v5  ;;  %v1820_v7 = vpop.f32.mrb[29].mxu0 }
 0x47f   :  { %v1013_v8 = vpop.f32.mrb[30].mxu0  ;;  %1873 = vmatpush3.bf16.msra.mxu1 %v1909_v3 }
 0x480   :  { %v1821_v10 = vpop.f32.mrb[31].mxu0  ;;  %1867 = vmatmul.mubr.msk.bf16.vlgmr.msra.gmra.mrb[44].mxu0 %vm209_vm2, %v1023_v6 }
 0x481   :  { %1886 = vmatprep.mubr.msk.bf16.mxu0 %vm2073_vm1, %v2072_v9 }
 0x4ce   :  { %v1072_v11 = vpop.f32.mrb[36].mxu1 }
 0x4cf   :  { %v1826_v12 = vpop.f32.mrb[37].mxu1  ;;  %v1400_v17 = vsel %vm85_vm0, %v1072_v11, 0.0 }
 0x4d0   :  { %v1075_v13 = vpop.f32.mrb[38].mxu1 }
 0x4d1   :  { %v1827_v14 = vpop.f32.mrb[39].mxu1 }
 0x53b   :  { %v1118_v15 = vpop.f32.mrb[32].mxu0  ;;  %v1164_v16 = vpop.f32.mrb[40].mxu1 }
 0x53c   :  { %v1401_v18 = vsel %vm85_vm0, %v1118_v15, 0.0  ;;  %v1832_v19 = vpop.f32.mrb[33].mxu0  ;;  %v1838_v20 = vpop.f32.mrb[41].mxu1  ;;  %v1403_v24 = vsel %vm85_vm0, %v1164_v16, 0.0 }
 0x53d   :  { %v1402_v21 = vadd.f32 %v1401_v18, %v1400_v17  ;;  %v1121_v22 = vpop.f32.mrb[34].mxu0  ;;  %v1167_v23 = vpop.f32.mrb[42].mxu1 }
 0x53e   :  { %v1833_v25 = vpop.f32.mrb[35].mxu0  ;;  %v1839_v26 = vpop.f32.mrb[43].mxu1 }
 0x53f   :  { %v1404_v27 = vadd.f32 %v1403_v24, %v1402_v21 }
 0x543   :  { %v1210_v28 = vpop.f32.mrb[36].mxu0  ;;  %v1256_v29 = vpop.f32.mrb[44].mxu1 }
 0x544   :  { %v1405_v30 = vsel %vm85_vm0, %v1210_v28, 0.0  ;;  %v1844_v31 = vpop.f32.mrb[37].mxu0  ;;  %v1850_v32 = vpop.f32.mrb[45].mxu1  ;;  %v1407_v43 = vsel %vm85_vm0, %v1256_v29, 0.0  ;;  %v1913_v28 = vld [vmem:[%s2455_s4 + $0x18] sm:$0xff]  }
 0x545   :  { %v1406_v33 = vadd.f32 %v1405_v30, %v1404_v27  ;;  %v1213_v34 = vpop.f32.mrb[38].mxu0  ;;  %v1259_v35 = vpop.f32.mrb[46].mxu1  ;;  %v1912_v27 = vld [vmem:[%s2455_s4 + $0x10] sm:$0xff]  }
 0x546   :  { %v1845_v36 = vpop.f32.mrb[39].mxu0  ;;  %v1851_v37 = vpop.f32.mrb[47].mxu1 }
 0x547   :  { %v2379_v38 = vadd.f32 %v1406_v33, %v2187_v0 }
 0x549   :  { %v1416_v39 = vsel %vm85_vm0, %v2379_v38, 0.0  ;;  %v1424_v40 = vmul.f32 %v2379_v38, %v2379_v38 }
 0x54a   :  { %1417 = vadd.xlane.f32.xlu0 %v1416_v39 }
 0x54b   :  { %v1302_v41 = vpop.f32.mrb[40].mxu0  ;;  %v1348_v42 = vpop.f32.mrb[48].mxu1  ;;  %v1426_v0 = vsel %vm85_vm0, %v1424_v40, 0.0 }
 0x54c   :  { %v1408_v44 = vsel %vm85_vm0, %v1302_v41, 0.0  ;;  %v1856_v45 = vpop.f32.mrb[41].mxu0  ;;  %v1862_v46 = vpop.f32.mrb[49].mxu1  ;;  %v1410_v50 = vsel %vm85_vm0, %v1348_v42, 0.0 }
 0x54d   :  { %v1409_v47 = vadd.f32 %v1408_v44, %v1407_v43  ;;  %v1305_v48 = vpop.f32.mrb[42].mxu0  ;;  %v1351_v49 = vpop.f32.mrb[50].mxu1 }
 0x54e   :  { %v1857_v51 = vpop.f32.mrb[43].mxu0  ;;  %1427 = vadd.xlane.f32.xlu0 %v1426_v0  ;;  %v1863_v52 = vpop.f32.mrb[51].mxu1 }
 0x54f   :  { %v1411_v53 = vadd.f32 %v1410_v50, %v1409_v47 }
 0x553   :  { %v1394_v54 = vpop.f32.mrb[44].mxu0 }
 0x554   :  { %v1412_v55 = vsel %vm85_vm0, %v1394_v54, 0.0  ;;  %v1868_v56 = vpop.f32.mrb[45].mxu0 }
 0x555   :  { %v1413_v57 = vadd.f32 %v1412_v55, %v1411_v53  ;;  %v1397_v58 = vpop.f32.mrb[46].mxu0 }
 0x556   :  { %v1869_v59 = vpop.f32.mrb[47].mxu0 }
 0x557   :  { %v2391_v60 = vadd.f32 %v1413_v57, %v2189_v1  ;;  %v1910_v1 = vld [vmem:[%s2455_s4] sm:$0xff]  }
 0x558   :  { %1879 = vmatpush3.bf16.msra.mxu0 %v1910_v1 }
 0x559   :  { %v1419_v61 = vsel %vm85_vm0, %v2391_v60, 0.0  ;;  %v1425_v62 = vmul.f32 %v2391_v60, %v2391_v60  ;;  %1880 = vmatprep.subr.bf16.mxu0 %v2072_v9 }
 0x55a   :  { %1420 = vadd.xlane.f32.xlu1 %v1419_v61 }
 0x55b   :  { %v1429_v63 = vsel %vm85_vm0, %v1425_v62, 0.0 }
 0x55c   :  { %1430 = vadd.xlane.f32.xlu0 %v1429_v63  ;;  %1881 = vmatpush3.bf16.msra.mxu0 %v1911_v4 }
 0x55d   :  { %1882 = vmatprep.subr.bf16.mxu0 %v2072_v9 }
 0x560   :  { %1883 = vmatpush3.bf16.msra.mxu0 %v1912_v27 }
 0x561   :  { %1884 = vmatprep.subr.bf16.mxu0 %v2072_v9 }
 0x564   :  { %1885 = vmatpush3.bf16.msra.mxu0 %v1913_v28 }
 0x5d7   :  { %v1418_v5 = vpop.xlane.xlu0 %1417 }
 0x5d8   :  { %v1422_v7 = vmul.f32 0.03125, %v1418_v5 }
 0x5da   :  { %v1436_v10 = vmul.f32 %v1422_v7, %v1422_v7  ;;  %v1434_v21 = vsub.f32 %v2379_v38, %v1422_v7 }
 0x5db   :  { %v1428_v6 = vpop.xlane.xlu0 %1427 }
 0x5dc   :  { %v1432_v8 = vmul.f32 0.03125, %v1428_v6 }
 0x5de   :  { %v1438_v11 = vsub.f32 %v1432_v8, %v1436_v10 }
 0x5e0   :  { %v1440_v15 = vadd.f32 1e-05, %v1438_v11 }
 0x5e2   :  { %1918 = vrsqrt.f32 %v1440_v15 }
 0x5e7   :  { %v1421_v12 = vpop.xlane.xlu1 %1420 }
 0x5e8   :  { %v1423_v13 = vmul.f32 0.03125, %v1421_v12 }
 0x5e9   :  { %v1431_v14 = vpop.xlane.xlu0 %1430 }
 0x5ea   :  { %v1437_v16 = vmul.f32 %v1423_v13, %v1423_v13  ;;  %v1433_v17 = vmul.f32 0.03125, %v1431_v14  ;;  %v1435_v22 = vsub.f32 %v2391_v60, %v1423_v13 }
 0x5ec   :  { %v1439_v18 = vsub.f32 %v1433_v17, %v1437_v16  ;;  %v1919_v20 = vpop.eup %1918 }
 0x5ed   :  { %v1444_v25 = vmul.f32 %v1919_v20, %v1434_v21 }
 0x5ee   :  { %v1441_v19 = vadd.f32 1e-05, %v1439_v18 }
 0x5f0   :  { %1920 = vrsqrt.f32 %v1441_v19 }
 0x5fa   :  { %v1921_v23 = vpop.eup %1920 }
 0x5fb   :  { %v1445_v24 = vmul.f32 %v1921_v23, %v1435_v22 }
 0x5fd   :  { %v1446_v26 = vpack.c.bf16 %v1445_v24, %v1444_v25 }
 0x5ff   :  { %1875 = vmatmul.mubr.msk.bf16.vlgmr.msra.gmra.mrb[52].mxu1 %vm85_vm0, %v1446_v26 }
 0x6d2   :  { %v1500_v29 = vpop.f32.mrb[52].mxu1 }
 0x6d3   :  { %v1876_v30 = vpop.f32.mrb[53].mxu1  ;;  %v1507_v32 = vmax.f32 %v1500_v29, 0.0 }
 0x6d4   :  { %v1503_v31 = vpop.f32.mrb[54].mxu1 }
 0x6d5   :  { %v1508_v33 = vmax.f32 %v1503_v31, 0.0  ;;  %v1877_v34 = vpop.f32.mrb[55].mxu1 }
 0x6d7   :  { %v1509_v35 = vpack.c.bf16 %v1508_v33, %v1507_v32 }
 0x6d9   :  { %1887 = vmatmul.mubr.msk.bf16.vlgmr.msra.gmra.mrb[48].mxu0 %vm1542_vm4, %v1509_v35 }
 0x6da   :  { %2021 = shalt.err (!%p2018_p8)
}
 0x6db   :  { %s2022_s10 = scalar_lea.hbm %s2458_s7, 1024 }
 0x6dc   :  { %p2023_p9 = scmp.ne.s32.totalorder %s2458_s7, %s2022_s10  ;;  %p2026_p10 = scmp.lt.u32.totalorder %s2022_s10, %s2458_s7 }
 0x6de   :  { %p2028_p11 = pnand %p2026_p10, %p2023_p9 }
 0x6e0   :  { %2031 = shalt.err (!%p2028_p11)
}
 0x6e1   :  { %1612 = dma.vmem_to_hbm [thread:$0]  %s1607_s8, 1024, %s2458_s7, [#allocation12], %s2068_s1, %s2068_s1, %s2069_s25  }
 0x6e2   :  { %s2079_s16 = smov [#allocation10]  }
 0x6e3   :  { %s1594_s19 = sshll.u32 %s2079_s16, 4  ;;  %s1595_s19 = int_to_ptr.vmem [resolvable:$true] %s1594_s19 }
 0x6e4   :  { %s2032_s20 = scalar_lea.vmem %s1595_s19, 256  ;;  %p2037_p13 = scmp.lt.s32.totalorder %s1595_s19, %s1595_s19 }
 0x6e5   :  { %p2033_p12 = scmp.ne.s32.totalorder %s1595_s19, %s2032_s20  ;;  %p2038_p0 = scmp.lt.s32.totalorder %s2032_s20, %s2032_s20 }
 0x6e7   :  { %p2039_p1 = por %p2038_p0, %p2037_p13 }
 0x6e9   :  { %p2040_p2 = pnand %p2039_p1, %p2033_p12 }
 0x7ac   :  { %v1580_v9 = vpop.f32.mrb[48].mxu0 }
 0x7ad   :  { %v1581_v36 = vadd.f32 %v1580_v9, %v2379_v38  ;;  %v1888_v37 = vpop.f32.mrb[49].mxu0 }
 0x7ae   :  { %v1583_v39 = vpop.f32.mrb[50].mxu0 }
 0x7af   :  { %1587 = vst.msk [vmem:[#allocation10] sm:$0xff] %vm85_vm0, %v1581_v36  ;;  %v1584_v40 = vadd.f32 %v1583_v39, %v2391_v60  ;;  %v1889_v41 = vpop.f32.mrb[51].mxu0 }
 0x7b1   :  { %1588 = vst.msk [vmem:[#allocation10 + $0x8] sm:$0xff] %vm85_vm0, %v1584_v40 }
 0x7b2   :  { %2043 = shalt.err (!%p2040_p2)
}
 0x7b3   :  { %s2044_s22 = scalar_lea.hbm %s2457_s6, 256 }
 0x7b4   :  { %p2045_p3 = scmp.ne.s32.totalorder %s2457_s6, %s2044_s22  ;;  %p2048_p4 = scmp.lt.u32.totalorder %s2044_s22, %s2457_s6 }
 0x7b6   :  { %p2050_p5 = pnand %p2048_p4, %p2045_p3 }
 0x7b8   :  { %2053 = shalt.err (!%p2050_p5)
}
 0x7b9   :  { %1600 = dma.vmem_to_hbm [thread:$0]  %s1595_s19, 256, %s2457_s6, [#allocation4], %s2068_s1, %s2068_s1, %s2069_s25  }
 0x7ba   :  { %2060 = dma.done.wait [#allocation4], 256  }
 0x7bb   :  { %2061 = vsyncadd [#allocation4], 4294967040 }
 0x7bc   :  { %2062 = dma.done.wait [#allocation12], 1024  }
 0x7bd   :  { %2063 = vsyncadd [#allocation12], 4294966272 }
 0x7be   :  { %1619 = vsyncpa [#allocation3], 1 }
 0x7bf   :  { %1620 = vsyncpa [#allocation6], 1 }
 0x7c0   :  { %1621 = vsyncpa [#allocation9], 1 }
 0x7c1   :  { %1622 = vsyncpa [#allocation4], 1 }
 0x7c2   :  { %1623 = vsyncpa [#allocation12], 1 }

</bundles_post_ra>
